<compile_context>
chip_gen: v7x
topology: tpu7x:2x2x1
jax: 0.10.0
libtpu: 0.0.40
codegen_flags: <defaults>
</compile_context>

<pallas_src>
import functools

import jax
import jax.numpy as jnp
from jax.experimental import pallas as pl
from jax.experimental.pallas import tpu as pltpu

_VMEM_LIMIT = 32 * 1024 * 1024  # explicit scoped-VMEM cap (safe on v5e/v6e/v7x)


# ---------------------------------------------------------------------------
# Kernel 1: VariancePredictor (conv -> relu -> LN -> dropout, x2, -> linear -> mask)
# ---------------------------------------------------------------------------
def _variance_predictor_kernel(
    seed_ref,                               # (1,) int32 in SMEM (scalar prefetch)
    x_ref,                                  # (S, H)
    keep_ref,                               # (S, 1)  1.0 = keep, 0.0 = masked
    w1_ref, b1_ref, g1_ref, be1_ref,        # conv1 (K,H,F), (1,F)x3
    w2_ref, b2_ref, g2_ref, be2_ref,        # conv2 (K,F,F), (1,F)x3
    wl_ref, bl_ref,                         # linear (1,F), (1,1)
    o_ref,                                  # (S, 1) prediction
    pad_scr,                                # VMEM scratch (S + 2*pad, F)
    *, kernel_size, p, training):
    S = x_ref.shape[0]
    pad = (kernel_size - 1) // 2

    if training and p > 0.0:
        pltpu.prng_seed(seed_ref[0] + pl.program_id(0))
        # integer-domain keep threshold: keep iff bits >= round(p * 2**32)
        thresh = jnp.uint32(min(int(round(p * (1 << 32))), (1 << 32) - 1))
        inv_keep = jnp.float32(1.0 / (1.0 - p))

    def dropout(y):
        if not training or p <= 0.0:
            return y
        # TODO(synk): RNG stream differs from torch.nn.Dropout (bitwise match impossible).
        bits = pltpu.bitcast(pltpu.prng_random_bits(y.shape), jnp.uint32)
        return jnp.where(bits >= thresh, y * inv_keep, jnp.float32(0.0))

    def conv_relu_ln_drop(w_ref, b_ref, g_ref, be_ref):
        # input is currently staged (zero-padded) in pad_scr
        acc = jnp.zeros((S, w_ref.shape[2]), dtype=jnp.float32)
        for k in range(kernel_size):                       # K shifted matmuls on MXU
            acc = acc + jnp.dot(pad_scr[k:k + S, :], w_ref[k],
                                preferred_element_type=jnp.float32)
        acc = acc + b_ref[...]
        acc = jnp.maximum(acc, 0.0)                        # ReLU
        mu = jnp.mean(acc, axis=-1, keepdims=True)         # LayerNorm over features
        var = jnp.mean((acc - mu) ** 2, axis=-1, keepdims=True)
        y = (acc - mu) * jax.lax.rsqrt(var + 1e-5)
        y = y * g_ref[...] + be_ref[...]
        return dropout(y)

    # zero the halo rows once; the middle S rows are overwritten below
    pad_scr[...] = jnp.zeros(pad_scr.shape, pad_scr.dtype)

    pad_scr[pad:pad + S, :] = x_ref[...].astype(jnp.float32)
    y = conv_relu_ln_drop(w1_ref, b1_ref, g1_ref, be1_ref)

    pad_scr[pad:pad + S, :] = y
    y = conv_relu_ln_drop(w2_ref, b2_ref, g2_ref, be2_ref)

    # Linear(F, 1) as a lane reduction (avoids a skinny N=1 matmul)
    pred = jnp.sum(y * wl_ref[...], axis=-1, keepdims=True) + bl_ref[...]   # (S, 1)
    o_ref[...] = (pred * keep_ref[...]).astype(o_ref.dtype)                 # masked_fill(mask, 0)


def variance_predictor(x, keep, prm, *, kernel_size, p=0.0, training=False, seed=0):
    """x: (B, S, H) float32, keep: (B, S) float32 (1=keep). Returns (B, S) prediction."""
    B, S, H = x.shape
    F = prm["w1"].shape[2]
    assert prm["w2"].shape[1] == H == F, "module requires variance_filter_size == encoder_hidden"
    if training:
        assert p < 1.0, "dropout p must be < 1"
    pad = (kernel_size - 1) // 2
    seed_arr = jnp.array([seed], dtype=jnp.int32)
    keep3 = keep.astype(jnp.float32).reshape(B, S, 1)

    kern = functools.partial(_variance_predictor_kernel,
                             kernel_size=kernel_size, p=p, training=training)
    shared2 = lambda b, sd: (0, 0)
    shared3 = lambda b, sd: (0, 0, 0)
    per_b = lambda b, sd: (b, 0, 0)

    out = pl.pallas_call(
        kern,
        out_shape=jax.ShapeDtypeStruct((B, S, 1), jnp.float32),
        grid_spec=pltpu.PrefetchScalarGridSpec(
            num_scalar_prefetch=1,                 # seed lands in SMEM
            grid=(B,),
            in_specs=[
                pl.BlockSpec((None, S, H), per_b),           # x       (batch squeezed)
                pl.BlockSpec((None, S, 1), per_b),           # keep
                pl.BlockSpec((kernel_size, H, F), shared3),  # w1
                pl.BlockSpec((1, F), shared2),               # b1
                pl.BlockSpec((1, F), shared2),               # gamma1
                pl.BlockSpec((1, F), shared2),               # beta1
                pl.BlockSpec((kernel_size, F, F), shared3),  # w2
                pl.BlockSpec((1, F), shared2),               # b2
                pl.BlockSpec((1, F), shared2),               # gamma2
                pl.BlockSpec((1, F), shared2),               # beta2
                pl.BlockSpec((1, F), shared2),               # w_linear
                pl.BlockSpec((1, 1), shared2),               # b_linear
            ],
            out_specs=pl.BlockSpec((None, S, 1), per_b),
            scratch_shapes=[pltpu.VMEM((S + 2 * pad, F), jnp.float32)],
        ),
        compiler_params=pltpu.CompilerParams(
            dimension_semantics=("parallel",),
            vmem_limit_bytes=_VMEM_LIMIT,
        ),
    )(seed_arr, x, keep3,
      prm["w1"], prm["b1"], prm["g1"], prm["beta1"],
      prm["w2"], prm["b2"], prm["g2"], prm["beta2"],
      prm["wl"], prm["bl"])
    return out[..., 0]


# ---------------------------------------------------------------------------
# Kernel 2: VarianceEncoder embedding (bucketize + embedding lookup + residual)
# ---------------------------------------------------------------------------
def _embed_add_kernel(x_ref, v_ref, bins_ref, emb_ref, o_ref):
    v = v_ref[...]                                                   # (S, 1)
    # torch.bucketize(v, bins): idx = #(boundaries strictly less than v)
    idx = jnp.sum((v > bins_ref[...]).astype(jnp.int32),
                  axis=-1, keepdims=True)                            # (S, 1)
    nb = emb_ref.shape[0]
    iota = jax.lax.broadcasted_iota(jnp.int32, (v.shape[0], nb), 1)  # (S, NB)
    onehot = (idx == iota).astype(jnp.float32)
    emb = jnp.dot(onehot, emb_ref[...], preferred_element_type=jnp.float32)  # (S, H)
    o_ref[...] = (x_ref[...] + emb).astype(o_ref.dtype)              # x + embedding


def embed_add(x, v, bins, emb):
    """x: (B,S,H), v: (B,S) values to bucketize, bins: (1,NB-1), emb: (NB,H)."""
    B, S, H = x.shape
    NB = emb.shape[0]
    NB1 = bins.shape[1]
    v3 = v.astype(jnp.float32).reshape(B, S, 1)
    per_b = lambda b: (b, 0, 0)
    return pl.pallas_call(
        _embed_add_kernel,
        out_shape=jax.ShapeDtypeStruct((B, S, H), x.dtype),
        grid=(B,),
        in_specs=[
            pl.BlockSpec((None, S, H), per_b),
            pl.BlockSpec((None, S, 1), per_b),
            pl.BlockSpec((1, NB1), lambda b: (0, 0)),
            pl.BlockSpec((NB, H), lambda b: (0, 0)),
        ],
        out_specs=pl.BlockSpec((None, S, H), per_b),
        compiler_params=pltpu.CompilerParams(
            dimension_semantics=("parallel",),
            vmem_limit_bytes=_VMEM_LIMIT,
        ),
    )(x, v3, bins, emb)


# ---------------------------------------------------------------------------
# Kernel 3: LengthRegulator (repeat_interleave + pad + truncate) as one-hot matmul
# ---------------------------------------------------------------------------
def _length_regulate_kernel(lo_ref, hi_ref, x_ref, o_ref):
    T = o_ref.shape[0]
    t = jax.lax.broadcasted_iota(jnp.int32, (T, 1), 0)               # output frame index
    lo = lo_ref[...]                                                 # (1, S) cumsum-exclusive
    hi = hi_ref[...]                                                 # (1, S) cumsum-inclusive
    onehot = jnp.logical_and(t >= lo, t < hi).astype(jnp.float32)    # (T, S) frame->phoneme
    o_ref[...] = jnp.dot(onehot, x_ref[...].astype(jnp.float32),
                         preferred_element_type=jnp.float32).astype(o_ref.dtype)


def length_regulate(x, durations, max_length):
    """x: (B,S,H), durations: (B,S) int.  Returns (B, max_length, H)."""
    # TODO(synk): PyTorch truncates to min(lengths.max(), max_length) (dynamic shape);
    # TPU needs a static width, so we always emit max_length frames (extra frames are
    # zero and masked True in tgt_mask).
    B, S, H = x.shape
    T = int(max_length)
    dur = durations.astype(jnp.int32)
    cum = jnp.cumsum(dur, axis=1)
    lo = (cum - dur).reshape(B, 1, S)
    hi = cum.reshape(B, 1, S)
    per_b = lambda b: (b, 0, 0)
    return pl.pallas_call(
        _length_regulate_kernel,
        out_shape=jax.ShapeDtypeStruct((B, T, H), x.dtype),
        grid=(B,),
        in_specs=[
            pl.BlockSpec((None, 1, S), per_b),
            pl.BlockSpec((None, 1, S), per_b),
            pl.BlockSpec((None, S, H), per_b),
        ],
        out_specs=pl.BlockSpec((None, T, H), per_b),
        compiler_params=pltpu.CompilerParams(
            dimension_semantics=("parallel",),
            vmem_limit_bytes=_VMEM_LIMIT,
        ),
    )(lo, hi, x)


# ---------------------------------------------------------------------------
# VarianceAdaptor.forward  (phoneme-level variances, no SNR encoder)
# ---------------------------------------------------------------------------
def variance_adaptor_forward(params, x, src_mask, *, tgt_pitch=None, tgt_energy=None,
                             tgt_duration=None, tgt_max_length,
                             c_pitch=1.0, c_energy=1.0, c_duration=1.0,
                             kernel_size=3, dropout_p=0.0, training=False, seed=0):
    keep = (~src_mask).astype(jnp.float32)                       # 1 = keep, 0 = masked

    # duration predictor (TODO(synk): ConformerVariancePredictor / duration_transformer=True
    # path (TransformerEncoder) not implemented; VariancePredictor path is used)
    log_duration = variance_predictor(x, keep, params["duration"],
                                      kernel_size=kernel_size, p=dropout_p,
                                      training=training, seed=seed)

    # pitch encoder
    pitch_pred = variance_predictor(x, keep, params["pitch"]["predictor"],
                                    kernel_size=kernel_size, p=dropout_p,
                                    training=training, seed=seed + 1)
    if tgt_pitch is not None:
        pitch_val = tgt_pitch
    else:
        pitch_pred = pitch_pred * c_pitch
        pitch_val = pitch_pred
    x = embed_add(x, pitch_val, params["pitch"]["bins"], params["pitch"]["emb"])

    # energy encoder (on the updated x, as in the PyTorch forward)
    energy_pred = variance_predictor(x, keep, params["energy"]["predictor"],
                                     kernel_size=kernel_size, p=dropout_p,
                                     training=training, seed=seed + 2)
    if tgt_energy is not None:
        energy_val = tgt_energy
    else:
        energy_pred = energy_pred * c_energy
        energy_val = energy_pred
    x = embed_add(x, energy_val, params["energy"]["bins"], params["energy"]["emb"])

    # duration rounding
    if tgt_duration is not None:
        duration_rounded = tgt_duration
    else:
        duration_rounded = jnp.maximum(
            jnp.round(jnp.exp(log_duration) - 1.0) * c_duration, 0.0).astype(jnp.int32)

    # length regulator
    x_reg = length_regulate(x, duration_rounded, tgt_max_length)
    lengths = jnp.sum(duration_rounded.astype(jnp.int32), axis=1)
    tgt_mask = jnp.arange(int(tgt_max_length))[None, :] >= lengths[:, None]

    return {"x": x_reg, "pitch": pitch_pred, "energy": energy_pred,
            "log_duration": log_duration, "duration_rounded": duration_rounded,
            "tgt_mask": tgt_mask}


# ---------------------------------------------------------------------------
# Pure-JAX references (for per-kernel correctness checks)
# ---------------------------------------------------------------------------
def ref_variance_predictor(x, keep, prm, kernel_size):
    pad = (kernel_size - 1) // 2

    def conv(h, w, b):
        hp = jnp.pad(h, ((0, 0), (pad, pad), (0, 0)))
        out = sum(jnp.einsum("bsc,cf->bsf", hp[:, k:k + h.shape[1]], w[k])
                  for k in range(kernel_size))
        return out + b

    def ln(h, g, be):
        mu = jnp.mean(h, axis=-1, keepdims=True)
        var = jnp.mean((h - mu) ** 2, axis=-1, keepdims=True)
        return (h - mu) * jax.lax.rsqrt(var + 1e-5) * g + be

    y = ln(jnp.maximum(conv(x, prm["w1"], prm["b1"]), 0.0), prm["g1"], prm["beta1"])
    y = ln(jnp.maximum(conv(y, prm["w2"], prm["b2"]), 0.0), prm["g2"], prm["beta2"])
    pred = jnp.sum(y * prm["wl"], axis=-1) + prm["bl"][0, 0]
    return pred * keep


def ref_embed_add(x, v, bins, emb):
    idx = jnp.sum((v[..., None] > bins.reshape(-1)).astype(jnp.int32), axis=-1)
    return x + emb[idx]


def ref_length_regulate(x, durations, max_length):
    dur = durations.astype(jnp.int32)
    cum = jnp.cumsum(dur, axis=1)
    lo = cum - dur
    t = jnp.arange(int(max_length))[None, :, None]
    onehot = ((t >= lo[:, None, :]) & (t < cum[:, None, :])).astype(x.dtype)
    return jnp.einsum("bts,bsh->bth", onehot, x)


# ---------------------------------------------------------------------------
if __name__ == "__main__":
    B, S, H = 2, 8, 32     # batch, phoneme sequence, encoder_hidden
    F = 32                 # variance_filter_size (== encoder_hidden, required by the module)
    K = 3                  # variance_kernel
    NB = 16                # variance_nbins
    T = 16                 # tgt_max_length

    key = jax.random.PRNGKey(0)
    keys = jax.random.split(key, 8)

    def init_predictor(k):
        k1, k2, k3, k4, k5, k6 = jax.random.split(k, 6)
        return {
            "w1": 0.1 * jax.random.normal(k1, (K, H, F), jnp.float32),
            "b1": 0.1 * jax.random.normal(k2, (1, F), jnp.float32),
            "g1": jnp.ones((1, F), jnp.float32),
            "beta1": jnp.zeros((1, F), jnp.float32),
            "w2": 0.1 * jax.random.normal(k3, (K, F, F), jnp.float32),
            "b2": 0.1 * jax.random.normal(k4, (1, F), jnp.float32),
            "g2": jnp.ones((1, F), jnp.float32),
            "beta2": jnp.zeros((1, F), jnp.float32),
            "wl": 0.1 * jax.random.normal(k5, (1, F), jnp.float32),
            "bl": 0.1 * jax.random.normal(k6, (1, 1), jnp.float32),
        }

    def init_encoder(k):
        return {
            "predictor": init_predictor(k),
            "bins": jnp.linspace(-1.0, 1.0, NB - 1, dtype=jnp.float32).reshape(1, NB - 1),
            "emb": 0.1 * jax.random.normal(jax.random.fold_in(k, 7), (NB, H), jnp.float32),
        }

    params = {
        "duration": init_predictor(keys[0]),
        "pitch": init_encoder(keys[1]),
        "energy": init_encoder(keys[2]),
    }

    x = jax.random.normal(keys[3], (B, S, H), jnp.float32)
    src_mask = jnp.zeros((B, S), dtype=bool).at[1, S - 2:].set(True)   # last 2 phonemes padded
    tgt_duration = jax.random.randint(keys[4], (B, S), 1, 4, dtype=jnp.int32)

    # --- per-kernel correctness checks vs pure-JAX references ---
    keep = (~src_mask).astype(jnp.float32)
    pred_k = variance_predictor(x, keep, params["duration"], kernel_size=K)
    pred_r = ref_variance_predictor(x, keep, params["duration"], K)
    assert jnp.allclose(pred_k, pred_r, atol=1e-4, rtol=1e-4), "variance_predictor mismatch"

    v_test = jax.random.normal(keys[5], (B, S), jnp.float32)
    ea_k = embed_add(x, v_test, params["pitch"]["bins"], params["pitch"]["emb"])
    ea_r = ref_embed_add(x, v_test, params["pitch"]["bins"], params["pitch"]["emb"])
    assert jnp.allclose(ea_k, ea_r, atol=1e-5, rtol=1e-5), "embed_add mismatch"

    lr_k = length_regulate(x, tgt_duration, T)
    lr_r = ref_length_regulate(x, tgt_duration, T)
    assert jnp.allclose(lr_k, lr_r, atol=1e-5, rtol=1e-5), "length_regulator mismatch"

    # --- full VarianceAdaptor forward (phoneme-level, inference pitch/energy,
    #     teacher-forced durations, eval-mode dropout) ---
    result = variance_adaptor_forward(
        params, x, src_mask,
        tgt_pitch=None, tgt_energy=None, tgt_duration=tgt_duration,
        tgt_max_length=T, kernel_size=K, dropout_p=0.5, training=False)
    result = jax.block_until_ready(result)

    assert result["x"].shape == (B, T, H)
    assert result["pitch"].shape == (B, S)
    assert result["energy"].shape == (B, S)
    assert result["log_duration"].shape == (B, S)
    assert result["duration_rounded"].shape == (B, S)
    assert result["tgt_mask"].shape == (B, T)
    assert bool(jnp.all(jnp.isfinite(result["x"])))

    print("KERNEL_OK")
</pallas_src>

<mosaic_0001>
module attributes {stable_mosaic.version = 11 : i64} {
  func.func @_variance_predictor_kernel(%arg0: i32, %arg1: memref<1xi32, #tpu.memory_space<smem>>, %arg2: memref<1x8x32xf32, #tpu.memory_space<vmem>>, %arg3: memref<1x8x1xf32, #tpu.memory_space<vmem>>, %arg4: memref<3x32x32xf32, #tpu.memory_space<vmem>>, %arg5: memref<1x32xf32, #tpu.memory_space<vmem>>, %arg6: memref<1x32xf32, #tpu.memory_space<vmem>>, %arg7: memref<1x32xf32, #tpu.memory_space<vmem>>, %arg8: memref<3x32x32xf32, #tpu.memory_space<vmem>>, %arg9: memref<1x32xf32, #tpu.memory_space<vmem>>, %arg10: memref<1x32xf32, #tpu.memory_space<vmem>>, %arg11: memref<1x32xf32, #tpu.memory_space<vmem>>, %arg12: memref<1x32xf32, #tpu.memory_space<vmem>>, %arg13: memref<1x1xf32, #tpu.memory_space<vmem>>, %arg14: memref<1x8x1xf32, #tpu.memory_space<vmem>>, %arg15: memref<10x32xf32, #tpu.memory_space<vmem>>) attributes {dimension_semantics = [#tpu.dimension_semantics<parallel>], iteration_bounds = array<i64: 2>, scalar_prefetch = 1 : i64, scratch_operands = 1 : i64, tpu.core_type = #tpu.core_type<tc>, window_params = [{transform_indices = @transform_0, window_bounds = array<i64: 1, 8, 32>}, {transform_indices = @transform_1, window_bounds = array<i64: 1, 8, 1>}, {pipeline_mode = #tpu.pipeline_mode<synchronous>, transform_indices = @transform_2, window_bounds = array<i64: 3, 32, 32>}, {pipeline_mode = #tpu.pipeline_mode<synchronous>, transform_indices = @transform_3, window_bounds = array<i64: 1, 32>}, {pipeline_mode = #tpu.pipeline_mode<synchronous>, transform_indices = @transform_4, window_bounds = array<i64: 1, 32>}, {pipeline_mode = #tpu.pipeline_mode<synchronous>, transform_indices = @transform_5, window_bounds = array<i64: 1, 32>}, {pipeline_mode = #tpu.pipeline_mode<synchronous>, transform_indices = @transform_6, window_bounds = array<i64: 3, 32, 32>}, {pipeline_mode = #tpu.pipeline_mode<synchronous>, transform_indices = @transform_7, window_bounds = array<i64: 1, 32>}, {pipeline_mode = #tpu.pipeline_mode<synchronous>, transform_indices = @transform_8, window_bounds = array<i64: 1, 32>}, {pipeline_mode = #tpu.pipeline_mode<synchronous>, transform_indices = @transform_9, window_bounds = array<i64: 1, 32>}, {pipeline_mode = #tpu.pipeline_mode<synchronous>, transform_indices = @transform_10, window_bounds = array<i64: 1, 32>}, {pipeline_mode = #tpu.pipeline_mode<synchronous>, transform_indices = @transform_11, window_bounds = array<i64: 1, 1>}, {transform_indices = @transform_12, window_bounds = array<i64: 1, 8, 1>}]} {
    %cst = arith.constant 0.000000e+00 : f32
    %0 = vector.broadcast %cst : f32 to vector<10x32xf32>
    %c0 = arith.constant 0 : index
    %c0_0 = arith.constant 0 : index
    %1 = vector.load %arg15[%c0, %c0_0] : memref<10x32xf32, #tpu.memory_space<vmem>>, vector<10x32xf32>
    tpu.vector_store %arg15[%c0, %c0_0], %0 {strides = array<i32>} : memref<10x32xf32, #tpu.memory_space<vmem>>, vector<10x32xf32>,
    %c0_1 = arith.constant 0 : index
    %c0_2 = arith.constant 0 : index
    %c0_3 = arith.constant 0 : index
    %2 = vector.load %arg2[%c0_1, %c0_2, %c0_3] : memref<1x8x32xf32, #tpu.memory_space<vmem>>, vector<1x8x32xf32>
    %3 = vector.shape_cast %2 : vector<1x8x32xf32> to vector<8x32xf32>
    %c1 = arith.constant 1 : index
    %c0_4 = arith.constant 0 : index
    %4 = vector.load %arg15[%c1, %c0_4] : memref<10x32xf32, #tpu.memory_space<vmem>>, vector<8x32xf32>
    tpu.vector_store %arg15[%c1, %c0_4], %3 {strides = array<i32>} : memref<10x32xf32, #tpu.memory_space<vmem>>, vector<8x32xf32>,
    %cst_5 = arith.constant 0.000000e+00 : f32
    %5 = vector.broadcast %cst_5 : f32 to vector<8x32xf32>
    %c0_6 = arith.constant 0 : index
    %c0_7 = arith.constant 0 : index
    %6 = vector.load %arg15[%c0_6, %c0_7] : memref<10x32xf32, #tpu.memory_space<vmem>>, vector<8x32xf32>
    %c0_8 = arith.constant 0 : index
    %c0_9 = arith.constant 0 : index
    %c0_10 = arith.constant 0 : index
    %7 = vector.load %arg4[%c0_8, %c0_9, %c0_10] : memref<3x32x32xf32, #tpu.memory_space<vmem>>, vector<1x32x32xf32>
    %8 = vector.shape_cast %7 : vector<1x32x32xf32> to vector<32x32xf32>
    %cst_11 = arith.constant dense<0.000000e+00> : vector<8x32xf32>
    %9 = tpu.matmul %6, %8, %cst_11 {dimension_numbers = #tpu.dot_dimension_numbers<[1], [0], [0], [1], [0, 0, 1, 1], [], []>} : vector<8x32xf32>, vector<32x32xf32>, vector<8x32xf32> -> vector<8x32xf32>
    %10 = arith.addf %5, %9 : vector<8x32xf32>
    %c1_12 = arith.constant 1 : index
    %c0_13 = arith.constant 0 : index
    %11 = vector.load %arg15[%c1_12, %c0_13] : memref<10x32xf32, #tpu.memory_space<vmem>>, vector<8x32xf32>
    %c1_14 = arith.constant 1 : index
    %c0_15 = arith.constant 0 : index
    %c0_16 = arith.constant 0 : index
    %12 = vector.load %arg4[%c1_14, %c0_15, %c0_16] : memref<3x32x32xf32, #tpu.memory_space<vmem>>, vector<1x32x32xf32>
    %13 = vector.shape_cast %12 : vector<1x32x32xf32> to vector<32x32xf32>
    %cst_17 = arith.constant dense<0.000000e+00> : vector<8x32xf32>
    %14 = tpu.matmul %11, %13, %cst_17 {dimension_numbers = #tpu.dot_dimension_numbers<[1], [0], [0], [1], [0, 0, 1, 1], [], []>} : vector<8x32xf32>, vector<32x32xf32>, vector<8x32xf32> -> vector<8x32xf32>
    %15 = arith.addf %10, %14 : vector<8x32xf32>
    %c2 = arith.constant 2 : index
    %c0_18 = arith.constant 0 : index
    %16 = vector.load %arg15[%c2, %c0_18] : memref<10x32xf32, #tpu.memory_space<vmem>>, vector<8x32xf32>
    %c2_19 = arith.constant 2 : index
    %c0_20 = arith.constant 0 : index
    %c0_21 = arith.constant 0 : index
    %17 = vector.load %arg4[%c2_19, %c0_20, %c0_21] : memref<3x32x32xf32, #tpu.memory_space<vmem>>, vector<1x32x32xf32>
    %18 = vector.shape_cast %17 : vector<1x32x32xf32> to vector<32x32xf32>
    %cst_22 = arith.constant dense<0.000000e+00> : vector<8x32xf32>
    %19 = tpu.matmul %16, %18, %cst_22 {dimension_numbers = #tpu.dot_dimension_numbers<[1], [0], [0], [1], [0, 0, 1, 1], [], []>} : vector<8x32xf32>, vector<32x32xf32>, vector<8x32xf32> -> vector<8x32xf32>
    %20 = arith.addf %15, %19 : vector<8x32xf32>
    %c0_23 = arith.constant 0 : index
    %c0_24 = arith.constant 0 : index
    %21 = vector.load %arg5[%c0_23, %c0_24] : memref<1x32xf32, #tpu.memory_space<vmem>>, vector<1x32xf32>
    %22 = vector.broadcast %21 : vector<1x32xf32> to vector<8x32xf32>
    %23 = arith.addf %20, %22 : vector<8x32xf32>
    %cst_25 = arith.constant 0.000000e+00 : f32
    %24 = vector.broadcast %cst_25 : f32 to vector<8x32xf32>
    %25 = arith.maximumf %23, %24 : vector<8x32xf32>
    %cst_26 = arith.constant dense<0.000000e+00> : vector<8xf32>
    %26 = vector.multi_reduction <add>, %25, %cst_26 [1] : vector<8x32xf32> to vector<8xf32>
    %27 = vector.shape_cast %26 : vector<8xf32> to vector<8x1xf32>
    %cst_27 = arith.constant 3.200000e+01 : f32
    %28 = vector.broadcast %cst_27 : f32 to vector<8x1xf32>
    %29 = arith.divf %27, %28 : vector<8x1xf32>
    %30 = vector.broadcast %29 : vector<8x1xf32> to vector<8x32xf32>
    %31 = arith.subf %25, %30 : vector<8x32xf32>
    %32 = arith.mulf %31, %31 : vector<8x32xf32>
    %cst_28 = arith.constant dense<0.000000e+00> : vector<8xf32>
    %33 = vector.multi_reduction <add>, %32, %cst_28 [1] : vector<8x32xf32> to vector<8xf32>
    %34 = vector.shape_cast %33 : vector<8xf32> to vector<8x1xf32>
    %cst_29 = arith.constant 3.200000e+01 : f32
    %35 = vector.broadcast %cst_29 : f32 to vector<8x1xf32>
    %36 = arith.divf %34, %35 : vector<8x1xf32>
    %37 = vector.broadcast %29 : vector<8x1xf32> to vector<8x32xf32>
    %38 = arith.subf %25, %37 : vector<8x32xf32>
    %cst_30 = arith.constant 9.99999974E-6 : f32
    %39 = vector.broadcast %cst_30 : f32 to vector<8x1xf32>
    %40 = arith.addf %36, %39 : vector<8x1xf32>
    %41 = math.rsqrt %40 : vector<8x1xf32>
    %42 = vector.broadcast %41 : vector<8x1xf32> to vector<8x32xf32>
    %43 = arith.mulf %38, %42 : vector<8x32xf32>
    %c0_31 = arith.constant 0 : index
    %c0_32 = arith.constant 0 : index
    %44 = vector.load %arg6[%c0_31, %c0_32] : memref<1x32xf32, #tpu.memory_space<vmem>>, vector<1x32xf32>
    %45 = vector.broadcast %44 : vector<1x32xf32> to vector<8x32xf32>
    %46 = arith.mulf %43, %45 : vector<8x32xf32>
    %c0_33 = arith.constant 0 : index
    %c0_34 = arith.constant 0 : index
    %47 = vector.load %arg7[%c0_33, %c0_34] : memref<1x32xf32, #tpu.memory_space<vmem>>, vector<1x32xf32>
    %48 = vector.broadcast %47 : vector<1x32xf32> to vector<8x32xf32>
    %49 = arith.addf %46, %48 : vector<8x32xf32>
    %c1_35 = arith.constant 1 : index
    %c0_36 = arith.constant 0 : index
    %50 = vector.load %arg15[%c1_35, %c0_36] : memref<10x32xf32, #tpu.memory_space<vmem>>, vector<8x32xf32>
    tpu.vector_store %arg15[%c1_35, %c0_36], %49 {strides = array<i32>} : memref<10x32xf32, #tpu.memory_space<vmem>>, vector<8x32xf32>,
    %cst_37 = arith.constant 0.000000e+00 : f32
    %51 = vector.broadcast %cst_37 : f32 to vector<8x32xf32>
    %c0_38 = arith.constant 0 : index
    %c0_39 = arith.constant 0 : index
    %52 = vector.load %arg15[%c0_38, %c0_39] : memref<10x32xf32, #tpu.memory_space<vmem>>, vector<8x32xf32>
    %c0_40 = arith.constant 0 : index
    %c0_41 = arith.constant 0 : index
    %c0_42 = arith.constant 0 : index
    %53 = vector.load %arg8[%c0_40, %c0_41, %c0_42] : memref<3x32x32xf32, #tpu.memory_space<vmem>>, vector<1x32x32xf32>
    %54 = vector.shape_cast %53 : vector<1x32x32xf32> to vector<32x32xf32>
    %cst_43 = arith.constant dense<0.000000e+00> : vector<8x32xf32>
    %55 = tpu.matmul %52, %54, %cst_43 {dimension_numbers = #tpu.dot_dimension_numbers<[1], [0], [0], [1], [0, 0, 1, 1], [], []>} : vector<8x32xf32>, vector<32x32xf32>, vector<8x32xf32> -> vector<8x32xf32>
    %56 = arith.addf %51, %55 : vector<8x32xf32>
    %c1_44 = arith.constant 1 : index
    %c0_45 = arith.constant 0 : index
    %57 = vector.load %arg15[%c1_44, %c0_45] : memref<10x32xf32, #tpu.memory_space<vmem>>, vector<8x32xf32>
    %c1_46 = arith.constant 1 : index
    %c0_47 = arith.constant 0 : index
    %c0_48 = arith.constant 0 : index
    %58 = vector.load %arg8[%c1_46, %c0_47, %c0_48] : memref<3x32x32xf32, #tpu.memory_space<vmem>>, vector<1x32x32xf32>
    %59 = vector.shape_cast %58 : vector<1x32x32xf32> to vector<32x32xf32>
    %cst_49 = arith.constant dense<0.000000e+00> : vector<8x32xf32>
    %60 = tpu.matmul %57, %59, %cst_49 {dimension_numbers = #tpu.dot_dimension_numbers<[1], [0], [0], [1], [0, 0, 1, 1], [], []>} : vector<8x32xf32>, vector<32x32xf32>, vector<8x32xf32> -> vector<8x32xf32>
    %61 = arith.addf %56, %60 : vector<8x32xf32>
    %c2_50 = arith.constant 2 : index
    %c0_51 = arith.constant 0 : index
    %62 = vector.load %arg15[%c2_50, %c0_51] : memref<10x32xf32, #tpu.memory_space<vmem>>, vector<8x32xf32>
    %c2_52 = arith.constant 2 : index
    %c0_53 = arith.constant 0 : index
    %c0_54 = arith.constant 0 : index
    %63 = vector.load %arg8[%c2_52, %c0_53, %c0_54] : memref<3x32x32xf32, #tpu.memory_space<vmem>>, vector<1x32x32xf32>
    %64 = vector.shape_cast %63 : vector<1x32x32xf32> to vector<32x32xf32>
    %cst_55 = arith.constant dense<0.000000e+00> : vector<8x32xf32>
    %65 = tpu.matmul %62, %64, %cst_55 {dimension_numbers = #tpu.dot_dimension_numbers<[1], [0], [0], [1], [0, 0, 1, 1], [], []>} : vector<8x32xf32>, vector<32x32xf32>, vector<8x32xf32> -> vector<8x32xf32>
    %66 = arith.addf %61, %65 : vector<8x32xf32>
    %c0_56 = arith.constant 0 : index
    %c0_57 = arith.constant 0 : index
    %67 = vector.load %arg9[%c0_56, %c0_57] : memref<1x32xf32, #tpu.memory_space<vmem>>, vector<1x32xf32>
    %68 = vector.broadcast %67 : vector<1x32xf32> to vector<8x32xf32>
    %69 = arith.addf %66, %68 : vector<8x32xf32>
    %cst_58 = arith.constant 0.000000e+00 : f32
    %70 = vector.broadcast %cst_58 : f32 to vector<8x32xf32>
    %71 = arith.maximumf %69, %70 : vector<8x32xf32>
    %cst_59 = arith.constant dense<0.000000e+00> : vector<8xf32>
    %72 = vector.multi_reduction <add>, %71, %cst_59 [1] : vector<8x32xf32> to vector<8xf32>
    %73 = vector.shape_cast %72 : vector<8xf32> to vector<8x1xf32>
    %cst_60 = arith.constant 3.200000e+01 : f32
    %74 = vector.broadcast %cst_60 : f32 to vector<8x1xf32>
    %75 = arith.divf %73, %74 : vector<8x1xf32>
    %76 = vector.broadcast %75 : vector<8x1xf32> to vector<8x32xf32>
    %77 = arith.subf %71, %76 : vector<8x32xf32>
    %78 = arith.mulf %77, %77 : vector<8x32xf32>
    %cst_61 = arith.constant dense<0.000000e+00> : vector<8xf32>
    %79 = vector.multi_reduction <add>, %78, %cst_61 [1] : vector<8x32xf32> to vector<8xf32>
    %80 = vector.shape_cast %79 : vector<8xf32> to vector<8x1xf32>
    %cst_62 = arith.constant 3.200000e+01 : f32
    %81 = vector.broadcast %cst_62 : f32 to vector<8x1xf32>
    %82 = arith.divf %80, %81 : vector<8x1xf32>
    %83 = vector.broadcast %75 : vector<8x1xf32> to vector<8x32xf32>
    %84 = arith.subf %71, %83 : vector<8x32xf32>
    %cst_63 = arith.constant 9.99999974E-6 : f32
    %85 = vector.broadcast %cst_63 : f32 to vector<8x1xf32>
    %86 = arith.addf %82, %85 : vector<8x1xf32>
    %87 = math.rsqrt %86 : vector<8x1xf32>
    %88 = vector.broadcast %87 : vector<8x1xf32> to vector<8x32xf32>
    %89 = arith.mulf %84, %88 : vector<8x32xf32>
    %c0_64 = arith.constant 0 : index
    %c0_65 = arith.constant 0 : index
    %90 = vector.load %arg10[%c0_64, %c0_65] : memref<1x32xf32, #tpu.memory_space<vmem>>, vector<1x32xf32>
    %91 = vector.broadcast %90 : vector<1x32xf32> to vector<8x32xf32>
    %92 = arith.mulf %89, %91 : vector<8x32xf32>
    %c0_66 = arith.constant 0 : index
    %c0_67 = arith.constant 0 : index
    %93 = vector.load %arg11[%c0_66, %c0_67] : memref<1x32xf32, #tpu.memory_space<vmem>>, vector<1x32xf32>
    %94 = vector.broadcast %93 : vector<1x32xf32> to vector<8x32xf32>
    %95 = arith.addf %92, %94 : vector<8x32xf32>
    %c0_68 = arith.constant 0 : index
    %c0_69 = arith.constant 0 : index
    %96 = vector.load %arg12[%c0_68, %c0_69] : memref<1x32xf32, #tpu.memory_space<vmem>>, vector<1x32xf32>
    %97 = vector.broadcast %96 : vector<1x32xf32> to vector<8x32xf32>
    %98 = arith.mulf %95, %97 : vector<8x32xf32>
    %cst_70 = arith.constant dense<0.000000e+00> : vector<8xf32>
    %99 = vector.multi_reduction <add>, %98, %cst_70 [1] : vector<8x32xf32> to vector<8xf32>
    %100 = vector.shape_cast %99 : vector<8xf32> to vector<8x1xf32>
    %c0_71 = arith.constant 0 : index
    %c0_72 = arith.constant 0 : index
    %101 = vector.load %arg13[%c0_71, %c0_72] : memref<1x1xf32, #tpu.memory_space<vmem>>, vector<1x1xf32>
    %102 = vector.broadcast %101 : vector<1x1xf32> to vector<8x1xf32>
    %103 = arith.addf %100, %102 : vector<8x1xf32>
    %c0_73 = arith.constant 0 : index
    %c0_74 = arith.constant 0 : index
    %c0_75 = arith.constant 0 : index
    %104 = vector.load %arg3[%c0_73, %c0_74, %c0_75] : memref<1x8x1xf32, #tpu.memory_space<vmem>>, vector<1x8x1xf32>
    %105 = vector.shape_cast %104 : vector<1x8x1xf32> to vector<8x1xf32>
    %106 = arith.mulf %103, %105 : vector<8x1xf32>
    %c0_76 = arith.constant 0 : index
    %c0_77 = arith.constant 0 : index
    %c0_78 = arith.constant 0 : index
    %107 = vector.load %arg14[%c0_76, %c0_77, %c0_78] : memref<1x8x1xf32, #tpu.memory_space<vmem>>, vector<1x8x1xf32>
    %108 = vector.shape_cast %107 : vector<1x8x1xf32> to vector<8x1xf32>
    %109 = vector.shape_cast %106 : vector<8x1xf32> to vector<1x8x1xf32>
    tpu.vector_store %arg14[%c0_76, %c0_77, %c0_78], %109 {strides = array<i32>} : memref<1x8x1xf32, #tpu.memory_space<vmem>>, vector<1x8x1xf32>,
    return
  }
  func.func @transform_0(%arg0: i32, %arg1: memref<1xi32, #tpu.memory_space<smem>>) -> (i32, i32, i32) {
    %c0_i32 = arith.constant 0 : i32
    %c0_i32_0 = arith.constant 0 : i32
    %c0_i32_1 = arith.constant 0 : i32
    return %arg0, %c0_i32, %c0_i32_0 : i32, i32, i32
  }
  func.func @transform_1(%arg0: i32, %arg1: memref<1xi32, #tpu.memory_space<smem>>) -> (i32, i32, i32) {
    %c0_i32 = arith.constant 0 : i32
    %c0_i32_0 = arith.constant 0 : i32
    %c0_i32_1 = arith.constant 0 : i32
    return %arg0, %c0_i32, %c0_i32_0 : i32, i32, i32
  }
  func.func @transform_2(%arg0: i32, %arg1: memref<1xi32, #tpu.memory_space<smem>>) -> (i32, i32, i32) {
    %c0_i32 = arith.constant 0 : i32
    %c0_i32_0 = arith.constant 0 : i32
    %c0_i32_1 = arith.constant 0 : i32
    %c0_i32_2 = arith.constant 0 : i32
    return %c0_i32, %c0_i32_0, %c0_i32_1 : i32, i32, i32
  }
  func.func @transform_3(%arg0: i32, %arg1: memref<1xi32, #tpu.memory_space<smem>>) -> (i32, i32) {
    %c0_i32 = arith.constant 0 : i32
    %c0_i32_0 = arith.constant 0 : i32
    %c0_i32_1 = arith.constant 0 : i32
    return %c0_i32, %c0_i32_0 : i32, i32
  }
  func.func @transform_4(%arg0: i32, %arg1: memref<1xi32, #tpu.memory_space<smem>>) -> (i32, i32) {
    %c0_i32 = arith.constant 0 : i32
    %c0_i32_0 = arith.constant 0 : i32
    %c0_i32_1 = arith.constant 0 : i32
    return %c0_i32, %c0_i32_0 : i32, i32
  }
  func.func @transform_5(%arg0: i32, %arg1: memref<1xi32, #tpu.memory_space<smem>>) -> (i32, i32) {
    %c0_i32 = arith.constant 0 : i32
    %c0_i32_0 = arith.constant 0 : i32
    %c0_i32_1 = arith.constant 0 : i32
    return %c0_i32, %c0_i32_0 : i32, i32
  }
  func.func @transform_6(%arg0: i32, %arg1: memref<1xi32, #tpu.memory_space<smem>>) -> (i32, i32, i32) {
    %c0_i32 = arith.constant 0 : i32
    %c0_i32_0 = arith.constant 0 : i32
    %c0_i32_1 = arith.constant 0 : i32
    %c0_i32_2 = arith.constant 0 : i32
    return %c0_i32, %c0_i32_0, %c0_i32_1 : i32, i32, i32
  }
  func.func @transform_7(%arg0: i32, %arg1: memref<1xi32, #tpu.memory_space<smem>>) -> (i32, i32) {
    %c0_i32 = arith.constant 0 : i32
    %c0_i32_0 = arith.constant 0 : i32
    %c0_i32_1 = arith.constant 0 : i32
    return %c0_i32, %c0_i32_0 : i32, i32
  }
  func.func @transform_8(%arg0: i32, %arg1: memref<1xi32, #tpu.memory_space<smem>>) -> (i32, i32) {
    %c0_i32 = arith.constant 0 : i32
    %c0_i32_0 = arith.constant 0 : i32
    %c0_i32_1 = arith.constant 0 : i32
    return %c0_i32, %c0_i32_0 : i32, i32
  }
  func.func @transform_9(%arg0: i32, %arg1: memref<1xi32, #tpu.memory_space<smem>>) -> (i32, i32) {
    %c0_i32 = arith.constant 0 : i32
    %c0_i32_0 = arith.constant 0 : i32
    %c0_i32_1 = arith.constant 0 : i32
    return %c0_i32, %c0_i32_0 : i32, i32
  }
  func.func @transform_10(%arg0: i32, %arg1: memref<1xi32, #tpu.memory_space<smem>>) -> (i32, i32) {
    %c0_i32 = arith.constant 0 : i32
    %c0_i32_0 = arith.constant 0 : i32
    %c0_i32_1 = arith.constant 0 : i32
    return %c0_i32, %c0_i32_0 : i32, i32
  }
  func.func @transform_11(%arg0: i32, %arg1: memref<1xi32, #tpu.memory_space<smem>>) -> (i32, i32) {
    %c0_i32 = arith.constant 0 : i32
    %c0_i32_0 = arith.constant 0 : i32
    %c0_i32_1 = arith.constant 0 : i32
    return %c0_i32, %c0_i32_0 : i32, i32
  }
  func.func @transform_12(%arg0: i32, %arg1: memref<1xi32, #tpu.memory_space<smem>>) -> (i32, i32, i32) {
    %c0_i32 = arith.constant 0 : i32
    %c0_i32_0 = arith.constant 0 : i32
    %c0_i32_1 = arith.constant 0 : i32
    return %arg0, %c0_i32, %c0_i32_0 : i32, i32, i32
  }
}

</mosaic_0001>

<bundles_post_ra>
// kernel: tpu_custom_call.1
= control target key start
LH: loop header
LB: loop body
LE: loop exit
PB: predicated region body
PF: predicated region fallthrough
CT: control target
= control target key end

     0   :  { %s1640_s0 = inlined_call_operand.<no memory space> [shape: s32[1], index: 0, kind: input, shape index: {}]   ;;  %s1641_s1 = inlined_call_operand.vmem [shape: f32[2,8,32], index: 1, kind: input, shape index: {}]   ;;  %s1642_s2 = inlined_call_operand.vmem [shape: f32[2,8,1], index: 2, kind: input, shape index: {}]   ;;  %s1643_s3 = inlined_call_operand.hbm [shape: f32[3,32,32], index: 3, kind: input, shape index: {}]   ;;  %s1644_s4 = inlined_call_operand.vmem [shape: f32[1,32], index: 4, kind: input, shape index: {}]   ;;  %s1645_s5 = inlined_call_operand.vmem [shape: f32[1,32], index: 5, kind: input, shape index: {}]   ;;  %s1646_s6 = inlined_call_operand.vmem [shape: f32[1,32], index: 6, kind: input, shape index: {}]   ;;  %s1647_s7 = inlined_call_operand.hbm [shape: f32[3,32,32], index: 7, kind: input, shape index: {}]   ;;  %s1648_s8 = inlined_call_operand.vmem [shape: f32[1,32], index: 8, kind: input, shape index: {}]   ;;  %s1649_s9 = inlined_call_operand.vmem [shape: f32[1,32], index: 9, kind: input, shape index: {}]   ;;  %s1650_s10 = inlined_call_operand.vmem [shape: f32[1,32], index: 10, kind: input, shape index: {}]   ;;  %s1651_s11 = inlined_call_operand.vmem [shape: f32[1,32], index: 11, kind: input, shape index: {}]   ;;  %s1652_s12 = inlined_call_operand.<no memory space> [shape: f32[1,1], index: 12, kind: input, shape index: {}]   ;;  %s1653_s13 = inlined_call_operand.vmem [shape: f32[2,8,1], index: 13, kind: output, shape index: {}]  }
   0x1   :  { %v19_v0 = vstv %s1652_s12 }
   0x2   :  { %20 = vst [vmem:[#allocation5] sm:$0x1] %v19_v0 }
   0x3   :  { %21 = vsyncpa [#allocation7], 0 }
   0x4   :  { %22 = vsyncpa [#allocation9], 0  ;;  %s1478_s26 = smov 0  }
   0x5 LB: > { %s1484_s27 = sadd.s32 4294967295, %s1396_s26   ;;  %p1130_p0 = scmp.ge.s32.totalorder %s1396_s26, 1  ;;  %s1396_s26 = sphi %s1478_s26, %s28_s26  }
   0x6   : > { %p321_p1 = scmp.lt.s32.totalorder %s1396_s26, 3  ;;  %s1398_s12 = smov [#allocation6]  }
   0x7   : > { %s333_s28 = sshll.u32 %s1398_s12, 4  ;;  %p1654_p3 = scmp.eq.s32.totalorder %s1484_s27, 0  ;;  %s334_s28 = int_to_ptr.vmem [resolvable:$true] %s333_s28 }
   0x8   : > { %p1488_p2 = pnand %p1130_p0, %p321_p1  ;;  %s1399_s29 = smov [#allocation8]  }
   0x9   : > { %s355_s30 = sshll.u32 %s1399_s29, 4  ;;  %s1326_s17 = scalar_lea.hbm %s1643_s3, 1536  ;;  %s1501_s30 = int_to_ptr.vmem [resolvable:$true] %s355_s30 }
   0xa   : > { %s1656_s0 = scalar_select %p1488_p2, 1, 0 }
   0xb   : > { %p1296_p4 = pneg %p1488_p2  ;;  %p1327_p6 = scmp.ne.s32.totalorder %s1643_s3, %s1326_s17 }
   0xc   : > { %p1333_p10 = scmp.lt.u32.totalorder %s1326_s17, %s1643_s3 }
   0xd   : > { %p1497_p5 = pnand %p1654_p3, %p1296_p4 }
   0xf   : > { %p1328_p7 = pneg %p1497_p5 }
  0x11   : > { %p1329_p8 = pnand %p1328_p7, %p1327_p6 }
  0x13   : > { %p1330_p9 = pneg %p1329_p8 }
  0x15   : > { %p1335_p11 = pnand %p1333_p10, %p1330_p9 }
  0x17   : > { %1338 = shalt.err (!%p1335_p11)
}
  0x18   : > { %s1339_s22 = scalar_lea.vmem %s334_s28, 1536  ;;  %p1347_p1 = scmp.lt.s32.totalorder %s334_s28, %s334_s28 }
  0x19   : > { %p1340_p12 = scmp.ne.s32.totalorder %s334_s28, %s1339_s22  ;;  %p1348_p4 = scmp.lt.s32.totalorder %s1339_s22, %s1339_s22 }
  0x1b   : > { %p1342_p13 = pnand %p1340_p12, %p1328_p7  ;;  %p1349_p3 = por %p1348_p4, %p1347_p1 }
  0x1d   : > { %p1343_p0 = pneg %p1342_p13 }
  0x1f   : > { %p1350_p2 = pnand %p1349_p3, %p1343_p0 }
  0x21   : > { %1353 = shalt.err (!%p1350_p2)
}
  0x22   : > { %s1400_s23 = smov 128   ;;  %s1401_s24 = smov 8  }
  0x23   : > { %1299 = dma.hbm_to_vmem [thread:$0]  (!%p1497_p5), %s1643_s3, 1536, %s334_s28, [#allocation7], %s1400_s23, %s1400_s23, %s1401_s24  }
  0x24   : > { %s1354_s16 = scalar_lea.hbm %s1647_s7, 1536 }
  0x25   : > { %p1355_p6 = scmp.ne.s32.totalorder %s1647_s7, %s1354_s16  ;;  %p1361_p8 = scmp.lt.u32.totalorder %s1354_s16, %s1647_s7 }
  0x27   : > { %p1357_p2 = pnand %p1355_p6, %p1328_p7 }
  0x29   : > { %p1358_p3 = pneg %p1357_p2 }
  0x2b   : > { %p1363_p9 = pnand %p1361_p8, %p1358_p3 }
  0x2d   : > { %1366 = shalt.err (!%p1363_p9)
}
  0x2e   : > { %s1367_s28 = scalar_lea.vmem %s1501_s30, 1536  ;;  %p1375_p13 = scmp.lt.s32.totalorder %s1501_s30, %s1501_s30 }
  0x2f   : > { %p1368_p10 = scmp.ne.s32.totalorder %s1501_s30, %s1367_s28  ;;  %p1376_p0 = scmp.lt.s32.totalorder %s1367_s28, %s1367_s28 }
  0x31   : > { %p1370_p11 = pnand %p1368_p10, %p1328_p7  ;;  %p1377_p1 = por %p1376_p0, %p1375_p13 }
  0x33   : > { %p1371_p12 = pneg %p1370_p11 }
  0x35   : > { %p1378_p4 = pnand %p1377_p1, %p1371_p12 }
  0x37   : > { %1381 = shalt.err (!%p1378_p4)
}
  0x38   : > { %1302 = dma.hbm_to_vmem [thread:$0]  (!%p1497_p5), %s1647_s7, 1536, %s1501_s30, [#allocation9], %s1400_s23, %s1400_s23, %s1401_s24  }
  0x39   : > { %p1658_p6 = scmp.ne.s32.totalorder %s1656_s0, 0 }
  0x3a   : > { %p1659_p2 = scmp.eq.s32.totalorder (!%p1658_p6), %s1484_s27, 0 }
  0x3b   : > { %400 = sbr.rel (%p1658_p6) target bundleno = 1320 (0x528), region = 68 }
  0x42   : > { %1387 = dma.done.wait (%p1659_p2), [#allocation7], 1536   ;;  %p1660_p7 = pmov %p1659_p2 }
  0x43   : > { %p1661_p3 = pmov %p1659_p2 }
  0x44   : > { %1389 = vsyncadd (%p1660_p7), [#allocation7], 4294965760 }
  0x45   : > { %1391 = dma.done.wait (%p1661_p3), [#allocation9], 1536   ;;  %p1662_p8 = pmov %p1659_p2 }
  0x46   : > { %vm460_vm0 = vcmask 261120   ;;  %vm462_vm1 = vcmask 254976   ;;  %v1402_v1 = vmov 0.0|0.0   ;;  %v1403_v2 = vmov 0.0   ;;  %p448_p5 = scmp.lt.s32.totalorder %s1484_s27, 1  ;;  %v473_v3 = vld [vmem:[#allocation6 + $0x20] sm:$0xff] }
  0x47   : > { %1393 = vsyncadd (%p1662_p8), [#allocation9], 4294965760  ;;  %1252 = vmatprep.subr.bf16.mxu0 %v1402_v1  ;;  %1258 = vmatprep.subr.bf16.mxu1 %v1402_v1  ;;  %461 = vst.msk [vmem:[#allocation2] sm:$0xff] %vm460_vm0, %v1403_v2  ;;  %vm1404_vm2 = vmmov 0   ;;  %v474_v4 = vld [vmem:[#allocation6 + $0x28] sm:$0xff]  ;;  %v467_v5 = vld [vmem:[#allocation6] sm:$0xff] }
  0x48   : > { %463 = vst.msk [vmem:[#allocation2 + $0x8] sm:$0x3] %vm462_vm1, %v1403_v2  ;;  %1194 = vmatprep.mubr.msk.f32.mxu0 %vm1404_vm2, %v1403_v2  ;;  %1205 = vmatprep.mubr.msk.f32.mxu1 %vm1404_vm2, %v1403_v2  ;;  %s1664_s27 = smov (!%p448_p5, %s1484_s27), 1  ;;  %v1253_v6 = vpack.c.bf16 %v474_v4, %v473_v3  ;;  %v468_v7 = vld [vmem:[#allocation6 + $0x8] sm:$0xff]  ;;  %v475_v8 = vld [vmem:[#allocation6 + $0x30] sm:$0xff]  ;;  %v476_v9 = vld [vmem:[#allocation6 + $0x38] sm:$0xff] }
  0x49   : > { %s1571_s0 = sshll.u32 %s1664_s27, 3  ;;  %v1259_v10 = vpack.c.bf16 %v468_v7, %v467_v5  ;;  %v469_v11 = vld [vmem:[#allocation6 + $0x10] sm:$0xff]  ;;  %v470_v12 = vld [vmem:[#allocation6 + $0x18] sm:$0xff]  ;;  %v1256_v14 = vpack.c.bf16 %v476_v9, %v475_v8  ;;  %v625_v16 = vld [vmem:[#allocation6 + $0x40] sm:$0xff]  ;;  %vm1039_vm3 = vcmask 7168  }
  0x4a   : > { %s451_s23 = scalar_lea.vmem %s1641_s1, %s1571_s0  ;;  %1254 = vmatpush3.bf16.msra.mxu0 %v1253_v6  ;;  %v1262_v15 = vpack.c.bf16 %v470_v12, %v469_v11  ;;  %v626_v17 = vld [vmem:[#allocation6 + $0x48] sm:$0xff]  ;;  %v627_v19 = vld [vmem:[#allocation6 + $0x50] sm:$0xff]  ;;  %v628_v20 = vld [vmem:[#allocation6 + $0x58] sm:$0xff]  ;;  %s459_s25 = scalar_lea.vmem %s1653_s13, %s1571_s0 }
  0x4b   : > { %v464_v13 = vld [vmem:[%s451_s23] sm:$0xff]  ;;  %1260 = vmatpush3.bf16.msra.mxu1 %v1259_v10  ;;  %1255 = vmatprep.subr.bf16.mxu0 %v1402_v1  ;;  %v1265_v18 = vpack.c.bf16 %v626_v17, %v625_v16  ;;  %v1268_v23 = vpack.c.bf16 %v628_v20, %v627_v19  ;;  %v750_v42 = vld [vmem:[#allocation8 + $0x20] sm:$0xff]  ;;  %v753_v49 = vld [vmem:[#allocation8 + $0x38] sm:$0xff]  ;;  %s455_s23 = scalar_lea.vmem %s1642_s2, %s1571_s0 }
  0x4c   : > { %465 = vst.msk [vmem:[#allocation2 + $0x1] sm:$0xff] %vm460_vm0, %v464_v13  ;;  %1261 = vmatprep.subr.bf16.mxu1 %v1402_v1  ;;  %v1143_v31 = vld [vmem:[%s1644_s4] ss:$0 sm:$0xff]  ;;  %v744_v45 = vld [vmem:[#allocation8] sm:$0xff]  ;;  %v752_v48 = vld [vmem:[#allocation8 + $0x30] sm:$0xff] }
  0x4d   : > { %v751_v43 = vld [vmem:[#allocation8 + $0x28] sm:$0xff]  ;;  %v746_v50 = vld [vmem:[#allocation8 + $0x10] sm:$0xff]  ;;  %v1274_v51 = vpack.c.bf16 %v753_v49, %v752_v48  ;;  %v747_v52 = vld [vmem:[#allocation8 + $0x18] sm:$0xff] }
  0x4e   : > { %1257 = vmatpush3.bf16.msra.mxu0 %v1256_v14  ;;  %v1271_v44 = vpack.c.bf16 %v751_v43, %v750_v42  ;;  %v745_v46 = vld [vmem:[#allocation8 + $0x8] sm:$0xff]  ;;  %v1280_v53 = vpack.c.bf16 %v747_v52, %v746_v50  ;;  %v902_v63 = vld [vmem:[#allocation8 + $0x40] sm:$0xff]  ;;  %v904_v4 = vld [vmem:[#allocation8 + $0x50] sm:$0xff] }
  0x4f   : > { %1263 = vmatpush3.bf16.msra.mxu1 %v1262_v15  ;;  %1264 = vmatprep.subr.bf16.mxu0 %v1402_v1  ;;  %v1277_v47 = vpack.c.bf16 %v745_v46, %v744_v45  ;;  %v1144_v58 = vld [vmem:[%s1645_s5] ss:$0 sm:$0xff]  ;;  %v905_v5 = vld [vmem:[#allocation8 + $0x58] sm:$0xff] }
  0x50   : > { %1270 = vmatprep.subr.bf16.mxu1 %v1402_v1  ;;  %v1145_v60 = vld [vmem:[%s1646_s6] ss:$0 sm:$0xff]  ;;  %v1286_v8 = vpack.c.bf16 %v905_v5, %v904_v4 }
  0x51   : > { %v903_v0 = vld [vmem:[#allocation8 + $0x48] sm:$0xff] }
  0x52   : > { %v1283_v3 = vpack.c.bf16 %v903_v0, %v902_v63  ;;  %v1149_v16 = vld [vmem:[%s1648_s8] ss:$0 sm:$0xff] }
  0x53   : > { %v471_v21 = vld [vmem:[#allocation2 + $0x1] sm:$0xff] }
  0x54   : > { %v466_v22 = vld [vmem:[#allocation2] sm:$0xff]  ;;  %1195 = vmatmul.mubr.msk.f32.vlgmr.msra.gmra.mrb[0].mxu0 %vm460_vm0, %v471_v21 }
  0x55   : > { %1206 = vmatmul.mubr.msk.f32.vlgmr.msra.gmra.mrb[0].mxu1 %vm460_vm0, %v466_v22  ;;  %1266 = vmatpush3.bf16.msra.mxu0 %v1265_v18  ;;  %v623_v24 = vld [vmem:[#allocation2 + $0x2] sm:$0xff] }
  0x56   : > { %1216 = vmatprep.mubr.msk.f32.mxu0 %vm1404_vm2, %v1403_v2  ;;  %1267 = vmatprep.subr.bf16.mxu0 %v1402_v1 }
  0x57   : > { %1227 = vmatprep.mubr.msk.f32.mxu1 %vm1404_vm2, %v1403_v2  ;;  %1272 = vmatpush3.bf16.msra.mxu1 %v1271_v44 }
  0x58   : > { %1273 = vmatprep.subr.bf16.mxu1 %v1402_v1 }
  0x59   : > { %1269 = vmatpush3.bf16.msra.mxu0 %v1268_v23 }
  0x5a   : > { %1276 = vmatprep.subr.bf16.mxu0 %v1402_v1 }
  0x5b   : > { %1275 = vmatpush3.bf16.msra.mxu1 %v1274_v51 }
  0x5c   : > { %1217 = vmatmul.mubr.msk.f32.vlgmr.msra.gmra.mrb[2].mxu0 %vm460_vm0, %v623_v24  ;;  %1282 = vmatprep.subr.bf16.mxu1 %v1402_v1 }
  0x5d   : > { %1238 = vmatprep.mubr.msk.f32.mxu0 %vm1404_vm2, %v1403_v2  ;;  %1278 = vmatpush3.bf16.msra.mxu0 %v1277_v47 }
  0x5e   : > { %1279 = vmatprep.subr.bf16.mxu0 %v1402_v1 }
  0x61   : > { %1281 = vmatpush3.bf16.msra.mxu0 %v1280_v53 }
 0x127   : > { %v546_v25 = vpop.f32.mrb[0].mxu0 }
 0x128   : > { %v619_v26 = vpop.f32.mrb[0].mxu1  ;;  %v1196_v27 = vpop.f32.mrb[1].mxu0 }
 0x129   : > { %v620_v28 = vadd.f32 %v619_v26, %v546_v25  ;;  %v1207_v29 = vpop.f32.mrb[1].mxu1 }
 0x12a   : > { %v1150_v29 = vld [vmem:[%s1649_s9] ss:$0 sm:$0xff] }
 0x12f   : > { %v698_v30 = vpop.f32.mrb[2].mxu0 }
 0x130   : > { %v702_v32 = vadd.f32 %v698_v30, %v620_v28  ;;  %v1218_v33 = vpop.f32.mrb[3].mxu0 }
 0x131   : > { %v1152_v33 = vld [vmem:[%s1651_s11] ss:$0 sm:$0xff] }
 0x132   : > { %v710_v34 = vadd.f32 %v1143_v31, %v702_v32  ;;  %v1151_v31 = vld [vmem:[%s1650_s10] ss:$0 sm:$0xff] }
 0x134   : > { %v711_v35 = vmax.f32 %v710_v34, 0.0 }
 0x136   : > { %v712_v36 = vsel %vm460_vm0, %v711_v35, 0.0 }
 0x137   : > { %713 = vadd.xlane.f32.xlu0 %v712_v36 }
 0x1c4   : > { %v714_v37 = vpop.xlane.xlu0 %713 }
 0x1c5   : > { %v716_v38 = vmul.f32 0.03125, %v714_v37  ;;  %v1153_v37 = vld [vmem:[#allocation5] ss:$0 sm:$0xff] }
 0x1c7   : > { %v717_v39 = vsub.f32 %v711_v35, %v716_v38  ;;  %v1037_v38 = vld [vmem:[%s455_s23] sm:$0xff] }
 0x1c9   : > { %v718_v40 = vmul.f32 %v717_v39, %v717_v39 }
 0x1cb   : > { %v719_v41 = vsel %vm460_vm0, %v718_v40, 0.0 }
 0x1cc   : > { %720 = vadd.xlane.f32.xlu0 %v719_v41 }
 0x259   : > { %v721_v54 = vpop.xlane.xlu0 %720 }
 0x25a   : > { %v722_v55 = vmul.f32 0.03125, %v721_v54 }
 0x25c   : > { %v723_v56 = vadd.f32 1e-05, %v722_v55 }
 0x25e   : > { %1322 = vrsqrt.f32 %v723_v56 }
 0x268   : > { %v1323_v57 = vpop.eup %1322 }
 0x269   : > { %v725_v59 = vmul.f32 %v1323_v57, %v717_v39 }
 0x26b   : > { %v733_v61 = vmul.f32 %v1144_v58, %v725_v59 }
 0x26d   : > { %v741_v62 = vadd.f32 %v1145_v60, %v733_v61 }
 0x26f   : > { %742 = vst.msk [vmem:[#allocation2 + $0x1] sm:$0xff] %vm460_vm0, %v741_v62 }
 0x276   : > { %v748_v6 = vld [vmem:[#allocation2 + $0x1] sm:$0xff] }
 0x277   : > { %v743_v7 = vld [vmem:[#allocation2] sm:$0xff]  ;;  %1228 = vmatmul.mubr.msk.f32.vlgmr.msra.gmra.mrb[2].mxu1 %vm460_vm0, %v748_v6 }
 0x278   : > { %1239 = vmatmul.mubr.msk.f32.vlgmr.msra.gmra.mrb[4].mxu0 %vm460_vm0, %v743_v7  ;;  %1284 = vmatpush3.bf16.msra.mxu1 %v1283_v3  ;;  %v900_v9 = vld [vmem:[#allocation2 + $0x2] sm:$0xff] }
 0x279   : > { %1249 = vmatprep.mubr.msk.f32.mxu1 %vm1404_vm2, %v1403_v2  ;;  %1285 = vmatprep.subr.bf16.mxu1 %v1402_v1 }
 0x27c   : > { %1287 = vmatpush3.bf16.msra.mxu1 %v1286_v8 }
 0x27f   : > { %1250 = vmatmul.mubr.msk.f32.vlgmr.msra.gmra.mrb[4].mxu1 %vm460_vm0, %v900_v9 }
 0x34a   : > { %v823_v10 = vpop.f32.mrb[2].mxu1 }
 0x34b   : > { %v896_v11 = vpop.f32.mrb[4].mxu0  ;;  %v1229_v13 = vpop.f32.mrb[3].mxu1 }
 0x34c   : > { %v897_v12 = vadd.f32 %v896_v11, %v823_v10  ;;  %v1240_v14 = vpop.f32.mrb[5].mxu0 }
 0x352   : > { %v975_v15 = vpop.f32.mrb[4].mxu1 }
 0x353   : > { %v979_v17 = vadd.f32 %v975_v15, %v897_v12  ;;  %v1251_v18 = vpop.f32.mrb[5].mxu1 }
 0x355   : > { %v987_v19 = vadd.f32 %v1149_v16, %v979_v17 }
 0x357   : > { %v988_v2 = vmax.f32 %v987_v19, 0.0 }
 0x359   : > { %v989_v1 = vsel %vm460_vm0, %v988_v2, 0.0 }
 0x35a   : > { %990 = vadd.xlane.f32.xlu1 %v989_v1 }
 0x3e7   : > { %v991_v20 = vpop.xlane.xlu1 %990 }
 0x3e8   : > { %v992_v21 = vmul.f32 0.03125, %v991_v20 }
 0x3ea   : > { %v993_v22 = vsub.f32 %v988_v2, %v992_v21 }
 0x3ec   : > { %v994_v23 = vmul.f32 %v993_v22, %v993_v22 }
 0x3ee   : > { %v995_v24 = vsel %vm460_vm0, %v994_v23, 0.0 }
 0x3ef   : > { %996 = vadd.xlane.f32.xlu1 %v995_v24 }
 0x47c   : > { %v997_v25 = vpop.xlane.xlu1 %996 }
 0x47d   : > { %v998_v26 = vmul.f32 0.03125, %v997_v25 }
 0x47f   : > { %v999_v27 = vadd.f32 1e-05, %v998_v26 }
 0x481   : > { %1324 = vrsqrt.f32 %v999_v27 }
 0x48b   : > { %v1325_v28 = vpop.eup %1324 }
 0x48c   : > { %v1001_v30 = vmul.f32 %v1325_v28, %v993_v22 }
 0x48e   : > { %v1009_v32 = vmul.f32 %v1150_v29, %v1001_v30 }
 0x490   : > { %v1017_v34 = vadd.f32 %v1151_v31, %v1009_v32 }
 0x492   : > { %v1025_v35 = vmul.f32 %v1152_v33, %v1017_v34 }
 0x494   : > { %v1026_v36 = vsel %vm460_vm0, %v1025_v35, 0.0 }
 0x495   : > { %1027 = vadd.xlane.f32.xlu0 %v1026_v36 }
 0x522   : > { %v1028_v39 = vpop.xlane.xlu0 %1027 }
 0x523   : > { %v1036_v40 = vadd.f32 %v1153_v37, %v1028_v39 }
 0x525   : > { %v1038_v41 = vmul.f32 %v1037_v38, %v1036_v40 }
 0x527   : > { %1040 = vst.msk [vmem:[%s459_s25] sm:$0xff] %vm1039_vm3, %v1038_v41 }
 0x528 PF: > { %s28_s26 = sadd.s32 1, %s1396_s26  }
 0x529   : > { %p25_p9 = scmp.ge.s32.totalorder %s28_s26, 4  }
 0x52b   :  { %27 = sbr.rel (!%p25_p9) target bundleno = 5 (0x5), region = 114 }
 0x532   :  { %1060 = vsyncpa [#allocation7], 1 }
 0x533   :  { %1062 = vsyncpa [#allocation7 + $0x1], 1 }
 0x534   :  { %1063 = vsyncpa [#allocation9], 1 }

</bundles_post_ra>
